<compile_context>
chip_gen: v7x
topology: tpu7x:2x2x1
jax: 0.10.0
libtpu: 0.0.40
codegen_flags: <defaults>
</compile_context>

<pallas_src>
import functools

import jax
import jax.numpy as jnp
from jax.experimental import pallas as pl
from jax.experimental.pallas import tpu as pltpu

LAYER_NUM = 5
INPUT_SIZE = 11
HIDDEN = 16


def _round_up(n, m):
    return ((n + m - 1) // m) * m


def _mlp_kernel(*refs):
    # refs = (x_ref, w0, b0, ..., wL, bL, out_ref); all transposed:
    #   x_ref: (INPUT_SIZE, TB), w_i: (out, in), b_i: (out, 1), out: (1, TB)
    x_ref = refs[0]
    out_ref = refs[-1]
    param_refs = refs[1:-1]
    n_linear = len(param_refs) // 2

    h = x_ref[...]                                      # (in, TB) f32
    for i in range(n_linear):
        w = param_refs[2 * i][...]                      # (out, in)
        b = param_refs[2 * i + 1][...]                  # (out, 1)
        # MXU matmul with f32 accumulation; bias broadcasts across lanes.
        h = jnp.dot(w, h, preferred_element_type=jnp.float32) + b
        if i < n_linear - 1:                            # ReLU on hidden layers only
            h = jnp.maximum(h, 0.0)
    out_ref[...] = h                                    # (1, TB), lane-dense


def init_params(key, layer_num=LAYER_NUM, input_size=INPUT_SIZE, hidden=HIDDEN):
    """nn.Linear-style U(-1/sqrt(fan_in), 1/sqrt(fan_in)); W stored (out, in)."""
    params = []
    prev = input_size
    dims = [hidden] * layer_num + [1]
    for out_dim in dims:
        key, kw, kb = jax.random.split(key, 3)
        bound = 1.0 / float(prev) ** 0.5
        w = jax.random.uniform(kw, (out_dim, prev), jnp.float32, -bound, bound)
        b = jax.random.uniform(kb, (out_dim, 1), jnp.float32, -bound, bound)
        params.append((w, b))
        prev = out_dim
    return params


@functools.partial(jax.jit, static_argnames=("tb_max",))
def ratio_nn_forward(x, flat_params, tb_max=2048):
    """x: (B, INPUT_SIZE). flat_params: [w0, b0, ..., w5, b5] with W (out, in)
    and b (out, 1). Returns (B, 1) float32, matching the PyTorch forward."""
    x = x.astype(jnp.float32)                 # matches the .float() cast
    batch, feat = x.shape

    # Batch tile: lane-aligned (multiple of 128), large enough to amortize the
    # ~0.35 us per-grid-step overhead, small enough to stay far below the VMEM
    # limits on v7x (64 MiB physical / 32 MiB scoped) as well as v5e/v6e.
    tb = min(tb_max, _round_up(batch, 128))
    b_pad = _round_up(batch, tb)
    grid = (b_pad // tb,)

    # Transposed, zero-padded input: batch on the lane axis.
    x_t = jnp.pad(x.T, ((0, 0), (0, b_pad - batch)))    # (feat, b_pad)

    # Weights/biases: full-array blocks with a constant index_map -> fetched
    # once and VMEM-resident across all grid steps (no per-step re-DMA).
    param_specs = [pl.BlockSpec(p.shape, lambda i: (0, 0)) for p in flat_params]

    param_bytes = sum(int(p.size) * 4 for p in flat_params)
    flops_per_row = 2 * (INPUT_SIZE * HIDDEN
                         + (LAYER_NUM - 1) * HIDDEN * HIDDEN
                         + HIDDEN * 1)
    cost = pl.CostEstimate(
        flops=flops_per_row * b_pad,
        transcendentals=0,
        bytes_accessed=b_pad * (feat + 1) * 4 + param_bytes,
    )

    out_t = pl.pallas_call(
        _mlp_kernel,
        out_shape=jax.ShapeDtypeStruct((1, b_pad), jnp.float32),
        grid=grid,
        in_specs=[pl.BlockSpec((feat, tb), lambda i: (0, i))] + param_specs,
        out_specs=pl.BlockSpec((1, tb), lambda i: (0, i)),
        compiler_params=pltpu.CompilerParams(
            dimension_semantics=("parallel",),   # v7x: shard batch over 2 TCs
        ),
        cost_estimate=cost,
    )(x_t, *flat_params)

    return out_t[:, :batch].T                            # (B, 1)


def _reference(x, flat_params):
    h = x.astype(jnp.float32)
    n_linear = len(flat_params) // 2
    for i in range(n_linear):
        w = flat_params[2 * i]          # (out, in)
        b = flat_params[2 * i + 1]      # (out, 1)
        h = h @ w.T + b[:, 0]
        if i < n_linear - 1:
            h = jnp.maximum(h, 0.0)
    return h


if __name__ == "__main__":
    key = jax.random.PRNGKey(0)
    key, kx = jax.random.split(key)

    batch = 8
    x = jax.random.normal(kx, (batch, INPUT_SIZE), dtype=jnp.float32)

    params = init_params(key)
    flat_params = [t for wb in params for t in wb]

    out = ratio_nn_forward(x, flat_params)
    out = jax.block_until_ready(out)

    ref = _reference(x, flat_params)
    assert out.shape == (batch, 1), out.shape
    assert jnp.allclose(out, ref, atol=1e-5, rtol=1e-5), "mismatch vs reference"

    print("KERNEL_OK")
</pallas_src>

<mosaic_0001>
module attributes {stable_mosaic.version = 11 : i64} {
  func.func @_mlp_kernel(%arg0: i32, %arg1: memref<11x128xf32, #tpu.memory_space<vmem>>, %arg2: memref<16x11xf32, #tpu.memory_space<vmem>>, %arg3: memref<16x1xf32, #tpu.memory_space<vmem>>, %arg4: memref<16x16xf32, #tpu.memory_space<vmem>>, %arg5: memref<16x1xf32, #tpu.memory_space<vmem>>, %arg6: memref<16x16xf32, #tpu.memory_space<vmem>>, %arg7: memref<16x1xf32, #tpu.memory_space<vmem>>, %arg8: memref<16x16xf32, #tpu.memory_space<vmem>>, %arg9: memref<16x1xf32, #tpu.memory_space<vmem>>, %arg10: memref<16x16xf32, #tpu.memory_space<vmem>>, %arg11: memref<16x1xf32, #tpu.memory_space<vmem>>, %arg12: memref<1x16xf32, #tpu.memory_space<vmem>>, %arg13: memref<1x1xf32, #tpu.memory_space<vmem>>, %arg14: memref<1x128xf32, #tpu.memory_space<vmem>>) attributes {dimension_semantics = [#tpu.dimension_semantics<parallel>], iteration_bounds = array<i64: 1>, scalar_prefetch = 0 : i64, scratch_operands = 0 : i64, tpu.core_type = #tpu.core_type<tc>, window_params = [{transform_indices = @transform_0, window_bounds = array<i64: 11, 128>}, {pipeline_mode = #tpu.pipeline_mode<synchronous>, transform_indices = @transform_1, window_bounds = array<i64: 16, 11>}, {pipeline_mode = #tpu.pipeline_mode<synchronous>, transform_indices = @transform_2, window_bounds = array<i64: 16, 1>}, {pipeline_mode = #tpu.pipeline_mode<synchronous>, transform_indices = @transform_3, window_bounds = array<i64: 16, 16>}, {pipeline_mode = #tpu.pipeline_mode<synchronous>, transform_indices = @transform_4, window_bounds = array<i64: 16, 1>}, {pipeline_mode = #tpu.pipeline_mode<synchronous>, transform_indices = @transform_5, window_bounds = array<i64: 16, 16>}, {pipeline_mode = #tpu.pipeline_mode<synchronous>, transform_indices = @transform_6, window_bounds = array<i64: 16, 1>}, {pipeline_mode = #tpu.pipeline_mode<synchronous>, transform_indices = @transform_7, window_bounds = array<i64: 16, 16>}, {pipeline_mode = #tpu.pipeline_mode<synchronous>, transform_indices = @transform_8, window_bounds = array<i64: 16, 1>}, {pipeline_mode = #tpu.pipeline_mode<synchronous>, transform_indices = @transform_9, window_bounds = array<i64: 16, 16>}, {pipeline_mode = #tpu.pipeline_mode<synchronous>, transform_indices = @transform_10, window_bounds = array<i64: 16, 1>}, {pipeline_mode = #tpu.pipeline_mode<synchronous>, transform_indices = @transform_11, window_bounds = array<i64: 1, 16>}, {pipeline_mode = #tpu.pipeline_mode<synchronous>, transform_indices = @transform_12, window_bounds = array<i64: 1, 1>}, {transform_indices = @transform_13, window_bounds = array<i64: 1, 128>}]} {
    %c0 = arith.constant 0 : index
    %c0_0 = arith.constant 0 : index
    %0 = vector.load %arg1[%c0, %c0_0] : memref<11x128xf32, #tpu.memory_space<vmem>>, vector<11x128xf32>
    %c0_1 = arith.constant 0 : index
    %c0_2 = arith.constant 0 : index
    %1 = vector.load %arg2[%c0_1, %c0_2] : memref<16x11xf32, #tpu.memory_space<vmem>>, vector<16x11xf32>
    %c0_3 = arith.constant 0 : index
    %c0_4 = arith.constant 0 : index
    %2 = vector.load %arg3[%c0_3, %c0_4] : memref<16x1xf32, #tpu.memory_space<vmem>>, vector<16x1xf32>
    %cst = arith.constant dense<0.000000e+00> : vector<16x128xf32>
    %3 = tpu.matmul %1, %0, %cst {dimension_numbers = #tpu.dot_dimension_numbers<[1], [0], [0], [1], [0, 0, 1, 1], [], []>} : vector<16x11xf32>, vector<11x128xf32>, vector<16x128xf32> -> vector<16x128xf32>
    %4 = vector.broadcast %2 : vector<16x1xf32> to vector<16x128xf32>
    %5 = arith.addf %3, %4 : vector<16x128xf32>
    %cst_5 = arith.constant 0.000000e+00 : f32
    %6 = vector.broadcast %cst_5 : f32 to vector<16x128xf32>
    %7 = arith.maximumf %5, %6 : vector<16x128xf32>
    %c0_6 = arith.constant 0 : index
    %c0_7 = arith.constant 0 : index
    %8 = vector.load %arg4[%c0_6, %c0_7] : memref<16x16xf32, #tpu.memory_space<vmem>>, vector<16x16xf32>
    %c0_8 = arith.constant 0 : index
    %c0_9 = arith.constant 0 : index
    %9 = vector.load %arg5[%c0_8, %c0_9] : memref<16x1xf32, #tpu.memory_space<vmem>>, vector<16x1xf32>
    %cst_10 = arith.constant dense<0.000000e+00> : vector<16x128xf32>
    %10 = tpu.matmul %8, %7, %cst_10 {dimension_numbers = #tpu.dot_dimension_numbers<[1], [0], [0], [1], [0, 0, 1, 1], [], []>} : vector<16x16xf32>, vector<16x128xf32>, vector<16x128xf32> -> vector<16x128xf32>
    %11 = vector.broadcast %9 : vector<16x1xf32> to vector<16x128xf32>
    %12 = arith.addf %10, %11 : vector<16x128xf32>
    %cst_11 = arith.constant 0.000000e+00 : f32
    %13 = vector.broadcast %cst_11 : f32 to vector<16x128xf32>
    %14 = arith.maximumf %12, %13 : vector<16x128xf32>
    %c0_12 = arith.constant 0 : index
    %c0_13 = arith.constant 0 : index
    %15 = vector.load %arg6[%c0_12, %c0_13] : memref<16x16xf32, #tpu.memory_space<vmem>>, vector<16x16xf32>
    %c0_14 = arith.constant 0 : index
    %c0_15 = arith.constant 0 : index
    %16 = vector.load %arg7[%c0_14, %c0_15] : memref<16x1xf32, #tpu.memory_space<vmem>>, vector<16x1xf32>
    %cst_16 = arith.constant dense<0.000000e+00> : vector<16x128xf32>
    %17 = tpu.matmul %15, %14, %cst_16 {dimension_numbers = #tpu.dot_dimension_numbers<[1], [0], [0], [1], [0, 0, 1, 1], [], []>} : vector<16x16xf32>, vector<16x128xf32>, vector<16x128xf32> -> vector<16x128xf32>
    %18 = vector.broadcast %16 : vector<16x1xf32> to vector<16x128xf32>
    %19 = arith.addf %17, %18 : vector<16x128xf32>
    %cst_17 = arith.constant 0.000000e+00 : f32
    %20 = vector.broadcast %cst_17 : f32 to vector<16x128xf32>
    %21 = arith.maximumf %19, %20 : vector<16x128xf32>
    %c0_18 = arith.constant 0 : index
    %c0_19 = arith.constant 0 : index
    %22 = vector.load %arg8[%c0_18, %c0_19] : memref<16x16xf32, #tpu.memory_space<vmem>>, vector<16x16xf32>
    %c0_20 = arith.constant 0 : index
    %c0_21 = arith.constant 0 : index
    %23 = vector.load %arg9[%c0_20, %c0_21] : memref<16x1xf32, #tpu.memory_space<vmem>>, vector<16x1xf32>
    %cst_22 = arith.constant dense<0.000000e+00> : vector<16x128xf32>
    %24 = tpu.matmul %22, %21, %cst_22 {dimension_numbers = #tpu.dot_dimension_numbers<[1], [0], [0], [1], [0, 0, 1, 1], [], []>} : vector<16x16xf32>, vector<16x128xf32>, vector<16x128xf32> -> vector<16x128xf32>
    %25 = vector.broadcast %23 : vector<16x1xf32> to vector<16x128xf32>
    %26 = arith.addf %24, %25 : vector<16x128xf32>
    %cst_23 = arith.constant 0.000000e+00 : f32
    %27 = vector.broadcast %cst_23 : f32 to vector<16x128xf32>
    %28 = arith.maximumf %26, %27 : vector<16x128xf32>
    %c0_24 = arith.constant 0 : index
    %c0_25 = arith.constant 0 : index
    %29 = vector.load %arg10[%c0_24, %c0_25] : memref<16x16xf32, #tpu.memory_space<vmem>>, vector<16x16xf32>
    %c0_26 = arith.constant 0 : index
    %c0_27 = arith.constant 0 : index
    %30 = vector.load %arg11[%c0_26, %c0_27] : memref<16x1xf32, #tpu.memory_space<vmem>>, vector<16x1xf32>
    %cst_28 = arith.constant dense<0.000000e+00> : vector<16x128xf32>
    %31 = tpu.matmul %29, %28, %cst_28 {dimension_numbers = #tpu.dot_dimension_numbers<[1], [0], [0], [1], [0, 0, 1, 1], [], []>} : vector<16x16xf32>, vector<16x128xf32>, vector<16x128xf32> -> vector<16x128xf32>
    %32 = vector.broadcast %30 : vector<16x1xf32> to vector<16x128xf32>
    %33 = arith.addf %31, %32 : vector<16x128xf32>
    %cst_29 = arith.constant 0.000000e+00 : f32
    %34 = vector.broadcast %cst_29 : f32 to vector<16x128xf32>
    %35 = arith.maximumf %33, %34 : vector<16x128xf32>
    %c0_30 = arith.constant 0 : index
    %c0_31 = arith.constant 0 : index
    %36 = vector.load %arg12[%c0_30, %c0_31] : memref<1x16xf32, #tpu.memory_space<vmem>>, vector<1x16xf32>
    %c0_32 = arith.constant 0 : index
    %c0_33 = arith.constant 0 : index
    %37 = vector.load %arg13[%c0_32, %c0_33] : memref<1x1xf32, #tpu.memory_space<vmem>>, vector<1x1xf32>
    %cst_34 = arith.constant dense<0.000000e+00> : vector<1x128xf32>
    %38 = tpu.matmul %36, %35, %cst_34 {dimension_numbers = #tpu.dot_dimension_numbers<[1], [0], [0], [1], [0, 0, 1, 1], [], []>} : vector<1x16xf32>, vector<16x128xf32>, vector<1x128xf32> -> vector<1x128xf32>
    %39 = vector.broadcast %37 : vector<1x1xf32> to vector<1x128xf32>
    %40 = arith.addf %38, %39 : vector<1x128xf32>
    %c0_35 = arith.constant 0 : index
    %c0_36 = arith.constant 0 : index
    %41 = vector.load %arg14[%c0_35, %c0_36] : memref<1x128xf32, #tpu.memory_space<vmem>>, vector<1x128xf32>
    tpu.vector_store %arg14[%c0_35, %c0_36], %40 {strides = array<i32>} : memref<1x128xf32, #tpu.memory_space<vmem>>, vector<1x128xf32>,
    return
  }
  func.func @transform_0(%arg0: i32) -> (i32, i32) {
    %c0_i32 = arith.constant 0 : i32
    %c0_i32_0 = arith.constant 0 : i32
    return %c0_i32, %arg0 : i32, i32
  }
  func.func @transform_1(%arg0: i32) -> (i32, i32) {
    %c0_i32 = arith.constant 0 : i32
    %c0_i32_0 = arith.constant 0 : i32
    %c0_i32_1 = arith.constant 0 : i32
    return %c0_i32, %c0_i32_0 : i32, i32
  }
  func.func @transform_2(%arg0: i32) -> (i32, i32) {
    %c0_i32 = arith.constant 0 : i32
    %c0_i32_0 = arith.constant 0 : i32
    %c0_i32_1 = arith.constant 0 : i32
    return %c0_i32, %c0_i32_0 : i32, i32
  }
  func.func @transform_3(%arg0: i32) -> (i32, i32) {
    %c0_i32 = arith.constant 0 : i32
    %c0_i32_0 = arith.constant 0 : i32
    %c0_i32_1 = arith.constant 0 : i32
    return %c0_i32, %c0_i32_0 : i32, i32
  }
  func.func @transform_4(%arg0: i32) -> (i32, i32) {
    %c0_i32 = arith.constant 0 : i32
    %c0_i32_0 = arith.constant 0 : i32
    %c0_i32_1 = arith.constant 0 : i32
    return %c0_i32, %c0_i32_0 : i32, i32
  }
  func.func @transform_5(%arg0: i32) -> (i32, i32) {
    %c0_i32 = arith.constant 0 : i32
    %c0_i32_0 = arith.constant 0 : i32
    %c0_i32_1 = arith.constant 0 : i32
    return %c0_i32, %c0_i32_0 : i32, i32
  }
  func.func @transform_6(%arg0: i32) -> (i32, i32) {
    %c0_i32 = arith.constant 0 : i32
    %c0_i32_0 = arith.constant 0 : i32
    %c0_i32_1 = arith.constant 0 : i32
    return %c0_i32, %c0_i32_0 : i32, i32
  }
  func.func @transform_7(%arg0: i32) -> (i32, i32) {
    %c0_i32 = arith.constant 0 : i32
    %c0_i32_0 = arith.constant 0 : i32
    %c0_i32_1 = arith.constant 0 : i32
    return %c0_i32, %c0_i32_0 : i32, i32
  }
  func.func @transform_8(%arg0: i32) -> (i32, i32) {
    %c0_i32 = arith.constant 0 : i32
    %c0_i32_0 = arith.constant 0 : i32
    %c0_i32_1 = arith.constant 0 : i32
    return %c0_i32, %c0_i32_0 : i32, i32
  }
  func.func @transform_9(%arg0: i32) -> (i32, i32) {
    %c0_i32 = arith.constant 0 : i32
    %c0_i32_0 = arith.constant 0 : i32
    %c0_i32_1 = arith.constant 0 : i32
    return %c0_i32, %c0_i32_0 : i32, i32
  }
  func.func @transform_10(%arg0: i32) -> (i32, i32) {
    %c0_i32 = arith.constant 0 : i32
    %c0_i32_0 = arith.constant 0 : i32
    %c0_i32_1 = arith.constant 0 : i32
    return %c0_i32, %c0_i32_0 : i32, i32
  }
  func.func @transform_11(%arg0: i32) -> (i32, i32) {
    %c0_i32 = arith.constant 0 : i32
    %c0_i32_0 = arith.constant 0 : i32
    %c0_i32_1 = arith.constant 0 : i32
    return %c0_i32, %c0_i32_0 : i32, i32
  }
  func.func @transform_12(%arg0: i32) -> (i32, i32) {
    %c0_i32 = arith.constant 0 : i32
    %c0_i32_0 = arith.constant 0 : i32
    %c0_i32_1 = arith.constant 0 : i32
    return %c0_i32, %c0_i32_0 : i32, i32
  }
  func.func @transform_13(%arg0: i32) -> (i32, i32) {
    %c0_i32 = arith.constant 0 : i32
    %c0_i32_0 = arith.constant 0 : i32
    return %c0_i32, %arg0 : i32, i32
  }
}

</mosaic_0001>

<bundles_post_ra>
// kernel: ratio_nn_forward.1
= control target key start
LH: loop header
LB: loop body
LE: loop exit
PB: predicated region body
PF: predicated region fallthrough
CT: control target
= control target key end

     0   :  { %vm69_vm0 = vcmask 1042432   ;;  %vm62_vm1 = vcmask 89088   ;;  %vm737_vm2 = vmmov 1   ;;  %v738_v2 = vmov 0   ;;  %s898_s0 = inlined_call_operand.vmem [shape: f32[11,128], index: 0, kind: input, shape index: {}]   ;;  %s899_s1 = inlined_call_operand.vmem [shape: f32[16,11], index: 1, kind: input, shape index: {}]   ;;  %s900_s2 = inlined_call_operand.vmem [shape: f32[16,1], index: 2, kind: input, shape index: {}]   ;;  %s901_s12 = inlined_call_operand.<no memory space> [shape: f32[1,1], index: 12, kind: input, shape index: {}]   ;;  %s902_s6 = inlined_call_operand.vmem [shape: f32[16,1], index: 6, kind: input, shape index: {}]   ;;  %s903_s8 = inlined_call_operand.vmem [shape: f32[16,1], index: 8, kind: input, shape index: {}]   ;;  %s904_s10 = inlined_call_operand.vmem [shape: f32[16,1], index: 10, kind: input, shape index: {}]   ;;  %s905_s3 = inlined_call_operand.vmem [shape: f32[16,16], index: 3, kind: input, shape index: {}]   ;;  %s906_s4 = inlined_call_operand.vmem [shape: f32[16,1], index: 4, kind: input, shape index: {}]   ;;  %s907_s5 = inlined_call_operand.vmem [shape: f32[16,16], index: 5, kind: input, shape index: {}]   ;;  %s908_s7 = inlined_call_operand.vmem [shape: f32[16,16], index: 7, kind: input, shape index: {}]   ;;  %s909_s9 = inlined_call_operand.vmem [shape: f32[16,16], index: 9, kind: input, shape index: {}]   ;;  %s910_s11 = inlined_call_operand.vmem [shape: f32[1,16], index: 11, kind: input, shape index: {}]   ;;  %s911_s13 = inlined_call_operand.vmem [shape: f32[1,128], index: 13, kind: output, shape index: {}]  }
   0x1   :  { %v46_v0 = vld [vmem:[%s898_s0] sm:$0xff]  ;;  %v47_v1 = vld [vmem:[%s898_s0 + $0x8] sm:$0x7]  ;;  %vm706_vm3 = vmpackc.low %vm69_vm0, %vm737_vm2  ;;  %735 = vset.pattern.permute.xlu0 %v738_v2  ;;  %v18_v3 = vstv %s901_s12  ;;  %736 = vset.pattern.permute.xlu1 %v738_v2  ;;  %vm164_vm4 = vcmask 130048   ;;  %v739_v62 = vmov 0.0|0.0   ;;  %vm740_vm5 = vmmov 0  }
   0x2   :  { %v705_v4 = vpack.c.bf16 %v47_v1, %v46_v0  ;;  %v48_v5 = vld [vmem:[%s899_s1] sm:$0xff]  ;;  %19 = vst [vmem:[#allocation2] sm:$0x1] %v18_v3  ;;  %v51_v7 = vld [vmem:[%s900_s2 + $0x8] sm:$0xff]  ;;  %v741_v63 = vmov 0.0  }
   0x3   :  { %v50_v6 = vld [vmem:[%s900_s2] sm:$0xff]  ;;  %667 = vmatprep.mubr.msk.f32.mxu0 %vm62_vm1, %v48_v5  ;;  %v49_v8 = vld [vmem:[%s899_s1 + $0x8] sm:$0xff] }
   0x4   :  { %54 = vperm.xlu0 %735, %v50_v6   ;;  %707 = vmatprep.subr.msk.bf16.mxu0 %vm706_vm3, %v705_v4  ;;  %v250_v9 = vld [vmem:[%s902_s6] sm:$0xff]  ;;  %v153_v15 = vld [vmem:[%s906_s4 + $0x8] sm:$0xff] }
   0x5   :  { %710 = vmatpush3.bf16.msk.msra.mxu0 %vm706_vm3, %v705_v4  ;;  %v347_v10 = vld [vmem:[%s903_s8] sm:$0xff]  ;;  %v251_v16 = vld [vmem:[%s902_s6 + $0x8] sm:$0xff] }
   0x6   :  { %v444_v11 = vld [vmem:[%s904_s10] sm:$0xff]  ;;  %v348_v17 = vld [vmem:[%s903_s8 + $0x8] sm:$0xff] }
   0x7   :  { %v150_v13 = vld [vmem:[%s905_s3] sm:$0xff]  ;;  %v445_v18 = vld [vmem:[%s904_s10 + $0x8] sm:$0xff] }
   0x8   :  { %59 = vperm.xlu0 %735, %v51_v7   ;;  %668 = vmatmul.mubr.msk.f32.vlgmr.msra.gmra.mrb[0].mxu0 %vm62_vm1, %v49_v8  ;;  %v152_v14 = vld [vmem:[%s906_s4] sm:$0xff]  ;;  %v151_v28 = vld [vmem:[%s905_s3 + $0x8] sm:$0xff] }
   0x9   :  { %v540_v12 = vld [vmem:[#allocation2] sm:$0x1]  ;;  %674 = vmatprep.mubr.msk.f32.mxu1 %vm164_vm4, %v150_v13  ;;  %156 = vperm.xlu1 %736, %v152_v14   ;;  %v249_v39 = vld [vmem:[%s907_s5 + $0x8] sm:$0xff] }
   0xa   :  { %v248_v29 = vld [vmem:[%s907_s5] sm:$0xff]  ;;  %v346_v50 = vld [vmem:[%s908_s7 + $0x8] sm:$0xff] }
   0xb   :  { %681 = vmatprep.mubr.msk.f32.mxu0 %vm164_vm4, %v248_v29  ;;  %v345_v40 = vld [vmem:[%s908_s7] sm:$0xff]  ;;  %v443_v61 = vld [vmem:[%s909_s9 + $0x8] sm:$0xff] }
   0xc   :  { %254 = vperm.xlu0 %735, %v250_v9   ;;  %v442_v51 = vld [vmem:[%s909_s9] sm:$0xff] }
   0xd   :  { %161 = vperm.xlu1 %736, %v153_v15   ;;  %v539_v9 = vld [vmem:[%s910_s11] sm:$0x1] }
  0x10   :  { %351 = vperm.xlu0 %735, %v347_v10   ;;  %v546_v10 = vlaneseq }
  0x11   :  { %259 = vperm.xlu1 %736, %v251_v16  }
  0x14   :  { %448 = vperm.xlu0 %735, %v444_v11   ;;  %v547_v11 = vshrl.u32 %v546_v10, 7 }
  0x15   :  { %356 = vperm.xlu1 %736, %v348_v17  }
  0x18   :  { %543 = vperm.xlu0 %735, %v540_v12   ;;  %v548_v12 = vsub.s32 0, %v547_v11 }
  0x19   :  { %453 = vperm.xlu1 %736, %v445_v18  }
  0x83   :  { %v55_v19 = vpop.permute.xlu0 %54 }
  0x87   :  { %v60_v20 = vpop.permute.xlu0 %59 }
  0x88   :  { %v157_v30 = vpop.permute.xlu1 %156 }
  0x8b   :  { %v255_v43 = vpop.permute.xlu0 %254 }
  0x8c   :  { %v162_v31 = vpop.permute.xlu1 %161 }
  0x8f   :  { %v352_v54 = vpop.permute.xlu0 %351 }
  0x90   :  { %v260_v41 = vpop.permute.xlu1 %259 }
  0x93   :  { %v449_v2 = vpop.permute.xlu0 %448 }
  0x94   :  { %v357_v52 = vpop.permute.xlu1 %356 }
  0x97   :  { %v544_v13 = vpop.permute.xlu0 %543 }
  0x98   :  { %v454_v0 = vpop.permute.xlu1 %453  ;;  %v549_v14 = vrot.slane %v544_v13, %v548_v12 }
  0xdb   :  { %v669_v21 = vpop.f32.mrb[0].mxu0 }
  0xdc   :  { %v145_v22 = vadd.f32 %v669_v21, %v60_v20  ;;  %v139_v23 = vpop.f32.mrb[1].mxu0 }
  0xdd   :  { %v140_v24 = vadd.f32 %v139_v23, %v55_v19 }
  0xde   :  { %v149_v25 = vmax.f32 %v145_v22, 0.0 }
  0xdf   :  { %v148_v26 = vmax.f32 %v140_v24, 0.0 }
  0xe1   :  { %v711_v27 = vpack.c.bf16 %v149_v25, %v148_v26 }
  0xe3   :  { %712 = vmatprep.subr.bf16.mxu1 %v711_v27 }
  0xe4   :  { %714 = vmatpush3.bf16.msra.mxu1 %v711_v27 }
  0xe7   :  { %675 = vmatmul.mubr.msk.f32.vlgmr.msra.gmra.mrb[0].mxu1 %vm164_vm4, %v151_v28 }
  0xe8   :  { %688 = vmatprep.mubr.msk.f32.mxu1 %vm164_vm4, %v345_v40 }
 0x1ba   :  { %v676_v32 = vpop.f32.mrb[0].mxu1 }
 0x1bb   :  { %v243_v33 = vadd.f32 %v676_v32, %v162_v31  ;;  %v237_v34 = vpop.f32.mrb[1].mxu1 }
 0x1bc   :  { %v238_v35 = vadd.f32 %v237_v34, %v157_v30 }
 0x1bd   :  { %v247_v36 = vmax.f32 %v243_v33, 0.0 }
 0x1be   :  { %v246_v37 = vmax.f32 %v238_v35, 0.0 }
 0x1c0   :  { %v715_v38 = vpack.c.bf16 %v247_v36, %v246_v37 }
 0x1c2   :  { %716 = vmatprep.subr.bf16.mxu0 %v715_v38 }
 0x1c3   :  { %718 = vmatpush3.bf16.msra.mxu0 %v715_v38 }
 0x1c6   :  { %682 = vmatmul.mubr.msk.f32.vlgmr.msra.gmra.mrb[2].mxu0 %vm164_vm4, %v249_v39 }
 0x1c7   :  { %695 = vmatprep.mubr.msk.f32.mxu0 %vm164_vm4, %v442_v51 }
 0x299   :  { %v683_v42 = vpop.f32.mrb[2].mxu0 }
 0x29a   :  { %v340_v44 = vadd.f32 %v683_v42, %v260_v41  ;;  %v334_v45 = vpop.f32.mrb[3].mxu0 }
 0x29b   :  { %v335_v46 = vadd.f32 %v334_v45, %v255_v43 }
 0x29c   :  { %v344_v47 = vmax.f32 %v340_v44, 0.0 }
 0x29d   :  { %v343_v48 = vmax.f32 %v335_v46, 0.0 }
 0x29f   :  { %v719_v49 = vpack.c.bf16 %v344_v47, %v343_v48 }
 0x2a1   :  { %720 = vmatprep.subr.bf16.mxu1 %v719_v49 }
 0x2a2   :  { %722 = vmatpush3.bf16.msra.mxu1 %v719_v49 }
 0x2a3   :  { %727 = vmatprep.subr.bf16.mxu1 %v739_v62 }
 0x2a5   :  { %689 = vmatmul.mubr.msk.f32.vlgmr.msra.gmra.mrb[2].mxu1 %vm164_vm4, %v346_v50 }
 0x2a6   :  { %702 = vmatprep.mubr.msk.f32.mxu1 %vm740_vm5, %v741_v63 }
 0x378   :  { %v690_v53 = vpop.f32.mrb[2].mxu1 }
 0x379   :  { %v437_v55 = vadd.f32 %v690_v53, %v357_v52  ;;  %v431_v56 = vpop.f32.mrb[3].mxu1 }
 0x37a   :  { %v432_v57 = vadd.f32 %v431_v56, %v352_v54 }
 0x37b   :  { %v441_v58 = vmax.f32 %v437_v55, 0.0 }
 0x37c   :  { %v440_v59 = vmax.f32 %v432_v57, 0.0 }
 0x37e   :  { %v723_v60 = vpack.c.bf16 %v441_v58, %v440_v59 }
 0x380   :  { %724 = vmatprep.subr.bf16.mxu0 %v723_v60 }
 0x381   :  { %726 = vmatpush3.bf16.msra.mxu0 %v723_v60 }
 0x384   :  { %696 = vmatmul.mubr.msk.f32.vlgmr.msra.gmra.mrb[4].mxu0 %vm164_vm4, %v443_v61 }
 0x457   :  { %v697_v1 = vpop.f32.mrb[4].mxu0 }
 0x458   :  { %v534_v3 = vadd.f32 %v697_v1, %v454_v0  ;;  %v528_v4 = vpop.f32.mrb[5].mxu0 }
 0x459   :  { %v529_v5 = vadd.f32 %v528_v4, %v449_v2 }
 0x45a   :  { %v538_v6 = vmax.f32 %v534_v3, 0.0 }
 0x45b   :  { %v537_v7 = vmax.f32 %v529_v5, 0.0 }
 0x45d   :  { %v728_v8 = vpack.c.bf16 %v538_v6, %v537_v7 }
 0x45f   :  { %729 = vmatpush3.bf16.msra.mxu1 %v728_v8 }
 0x462   :  { %703 = vmatmul.mubr.msk.f32.vlgmr.msra.gmra.mrb[4].mxu1 %vm164_vm4, %v539_v9 }
 0x535   :  { %v619_v15 = vpop.f32.mrb[4].mxu1 }
 0x536   :  { %v620_v16 = vadd.f32 %v619_v15, %v549_v14  ;;  %v704_v17 = vpop.f32.mrb[5].mxu1 }
 0x538   :  { %623 = vst [vmem:[%s911_s13] sm:$0x1] %v620_v16 }

</bundles_post_ra>
